<compile_context>
chip_gen: v6e
topology: v6e:2x2x1
jax: 0.10.0
libtpu: 0.0.40
codegen_flags: <defaults>
</compile_context>

<pallas_src>
import functools

import jax
import jax.numpy as jnp
from jax.experimental import pallas as pl
from jax.experimental.pallas import tpu as pltpu

_MiB = 1024 * 1024


def _vmem_capacity_bytes():
    try:
        return int(pltpu.get_tpu_info().vmem_capacity_bytes)
    except Exception:  # unknown backend / interpret mode
        return 128 * _MiB


def _vmem_limit_bytes():
    """Scoped-VMEM limit sized per generation with ~16 MiB headroom."""
    cap = _vmem_capacity_bytes()
    return int(min(max(cap - 16 * _MiB, 32 * _MiB), 112 * _MiB))


def default_block_sizes(n_tokens, vocab):
    """Chip-aware (block_tokens, block_vocab) defaults.

    Targets the per-generation MXU roofline from the perf review:
      v5e (~240 flop/B)                      -> Tt >= 256
      v7x (~311 flop/B, 64 MiB VMEM, 2 TC)   -> Tt ~ 512, Tv ~ 1024
      v6e (~680 flop/B, 128 MiB VMEM)        -> Tt ~ 512,  Tv ~ 2048
    """
    cap = _vmem_capacity_bytes()
    if cap <= 64 * _MiB:      # v7x-class: small VMEM, two TensorCores
        bt, bv = 512, 1024
    else:                      # v5e / v6e: 128 MiB VMEM
        bt, bv = 512, 2048
    bt = min(bt, n_tokens)
    # Keep alignment and >= 2 token blocks (megacore sharding on v7x).
    while bt > 8 and (n_tokens % bt != 0 or n_tokens // bt < 2):
        bt //= 2
    bv = min(bv, vocab)
    while bv > 128 and vocab % bv != 0:
        bv //= 2
    return bt, bv


def _lmhead_ce_kernel(hidden_ref, w_ref, labels_ref, *refs, write_logits):
    """One grid step: (token tile t [parallel], vocab tile v [arbitrary]).

    hidden_ref : [Tt, H]   bf16 token hidden states (tile t)
    w_ref      : [H, Tv]   bf16 lm_head weight (vocab tile v)
    labels_ref : [Tt, 1]   int32 labels (global vocab ids; <0 => ignored)
    logits_ref : [Tt, Tv]  logits tile (only if write_logits)
    loss_ref   : [Tt, 1]   f32 per-token loss (written at last vocab step)
    m_sc/l_sc/g_sc : [Tt, 1] f32 scratch (running max / sum / label logit)
    """
    if write_logits:
        logits_ref, loss_ref, m_sc, l_sc, g_sc = refs
    else:
        logits_ref = None
        loss_ref, m_sc, l_sc, g_sc = refs

    v = pl.program_id(1)
    n_v = pl.num_programs(1)

    @pl.when(v == 0)
    def _():
        m_sc[...] = jnp.full_like(m_sc, -jnp.inf)
        l_sc[...] = jnp.zeros_like(l_sc)
        g_sc[...] = jnp.zeros_like(g_sc)

    # lm_head matmul on the MXU: bf16 operands, f32 accumulation.
    logits = jnp.dot(hidden_ref[...], w_ref[...],
                     preferred_element_type=jnp.float32)          # [Tt, Tv]
    if write_logits:
        logits_ref[...] = logits.astype(logits_ref.dtype)

    # Online logsumexp across vocab tiles.
    m_prev = m_sc[...]                                            # [Tt, 1]
    m_new = jnp.maximum(m_prev, jnp.max(logits, axis=-1, keepdims=True))
    alpha = jnp.exp(m_prev - m_new)
    l_sc[...] = alpha * l_sc[...] + jnp.sum(jnp.exp(logits - m_new),
                                            axis=-1, keepdims=True)
    m_sc[...] = m_new

    # Gather the label logit: the label lands in exactly one vocab tile.
    # Compare fixed iota vs shifted label (cheap [Tt,1] subtract, not a
    # [Tt,Tv] add).
    tv = logits.shape[-1]
    labels = labels_ref[...]                                      # [Tt, 1]
    shifted = labels - v * tv                                     # [Tt, 1]
    hit = jax.lax.broadcasted_iota(jnp.int32, logits.shape, 1) == shifted
    g_sc[...] += jnp.sum(jnp.where(hit, logits, 0.0),
                         axis=-1, keepdims=True)

    @pl.when(v == n_v - 1)
    def _():
        lse = m_sc[...] + jnp.log(l_sc[...])                      # [Tt, 1]
        valid = (labels >= 0).astype(jnp.float32)                 # ignore_index=-100
        loss_ref[...] = valid * (lse - g_sc[...])


@functools.partial(jax.jit,
                   static_argnames=("block_tokens", "block_vocab",
                                    "return_logits", "logits_dtype"))
def identity_wrapper_forward(input_ids, labels, embed_table, lm_head_w, *,
                             block_tokens, block_vocab,
                             return_logits=True, logits_dtype=jnp.bfloat16):
    """Forward of IdentityWrapper around an identity-patched causal LM.

    input_ids   : [B, S] int32
    labels      : [B, S] int32  (labels < 0 are ignored, ignore_index=-100)
    embed_table : [V, H]  (store in bf16; no per-call cast is performed here)
    lm_head_w   : [H, V]  (store in bf16; no per-call cast is performed here)
    Returns (loss scalar, logits [B, S, V] in `logits_dtype`, or None when
    return_logits=False).
    """
    B, S = input_ids.shape
    V, H = embed_table.shape
    N = B * S
    assert lm_head_w.shape == (H, V), (lm_head_w.shape, (H, V))
    assert N % block_tokens == 0, (N, block_tokens)
    assert V % block_vocab == 0, (V, block_vocab)

    # Identity layers are a no-op: the hidden state IS the embedding row.
    # Gathering from a bf16 table keeps MXU operands bf16 with no extra f32
    # pass over HBM.
    hidden = jnp.take(embed_table, input_ids.reshape(-1), axis=0)   # [N, H]
    labels_flat = labels.reshape(N, 1).astype(jnp.int32)

    grid = (N // block_tokens, V // block_vocab)

    in_specs = [
        pl.BlockSpec((block_tokens, H), lambda t, v: (t, 0)),
        pl.BlockSpec((H, block_vocab), lambda t, v: (0, v)),
        pl.BlockSpec((block_tokens, 1), lambda t, v: (t, 0)),
    ]
    loss_spec = pl.BlockSpec((block_tokens, 1), lambda t, v: (t, 0))
    loss_shape = jax.ShapeDtypeStruct((N, 1), jnp.float32)

    if return_logits:
        out_shape = (jax.ShapeDtypeStruct((N, V), logits_dtype), loss_shape)
        out_specs = (pl.BlockSpec((block_tokens, block_vocab),
                                  lambda t, v: (t, v)),
                     loss_spec)
    else:
        out_shape = (loss_shape,)
        out_specs = (loss_spec,)

    outs = pl.pallas_call(
        functools.partial(_lmhead_ce_kernel, write_logits=return_logits),
        out_shape=out_shape,
        grid_spec=pltpu.PrefetchScalarGridSpec(
            num_scalar_prefetch=0,
            grid=grid,
            in_specs=in_specs,
            out_specs=out_specs,
            scratch_shapes=[pltpu.VMEM((block_tokens, 1), jnp.float32)] * 3,
        ),
        compiler_params=pltpu.CompilerParams(
            # token axis parallel (megacore); vocab axis carries the
            # online-softmax state -> arbitrary and innermost.
            dimension_semantics=("parallel", "arbitrary"),
            # Sized per generation (not hard-coded 64 MiB, which is the whole
            # physical VMEM on v7x); ~16 MiB headroom.
            vmem_limit_bytes=_vmem_limit_bytes(),
        ),
    )(hidden, lm_head_w, labels_flat)

    if return_logits:
        logits_flat, per_token_loss = outs
        logits = logits_flat.reshape(B, S, V)
    else:
        (per_token_loss,) = outs
        logits = None

    loss = jnp.sum(per_token_loss) / B      # reduction='sum' / batch_size
    return loss, logits


def _reference(input_ids, labels, embed_table, lm_head_w):
    B, S = input_ids.shape
    V, H = embed_table.shape
    hidden = jnp.take(embed_table, input_ids.reshape(-1), axis=0)
    logits = jnp.dot(hidden, lm_head_w,
                     preferred_element_type=jnp.float32)            # [N, V] f32
    logp = jax.nn.log_softmax(logits, axis=-1)
    lbl = labels.reshape(-1, 1)
    nll = -jnp.take_along_axis(logp, jnp.maximum(lbl, 0), axis=-1)
    valid = (lbl >= 0).astype(jnp.float32)
    loss = jnp.sum(nll * valid) / B
    return loss, logits.reshape(B, S, V)


if __name__ == "__main__":
    # Small shapes consistent with the forward: batch=2, seq=8, hidden=32,
    # vocab=256.  Explicit (8, 128) tiles exercise both grid axes and the
    # online logsumexp; the default-tile path is also run below.
    B, S, H, V = 2, 8, 32, 256

    key = jax.random.PRNGKey(0)
    k_emb, k_head, k_ids, k_lab = jax.random.split(key, 4)

    # Params are cast to bf16 ONCE here (outside the jitted step), per the
    # perf review -- no per-call H*V cast inside the forward.
    embed_table = (jax.random.normal(k_emb, (V, H), jnp.float32)
                   * 0.02).astype(jnp.bfloat16)
    lm_head_w = (jax.random.normal(k_head, (H, V), jnp.float32)
                 * 0.02).astype(jnp.bfloat16)
    input_ids = jax.random.randint(k_ids, (B, S), 0, V, dtype=jnp.int32)
    labels = jax.random.randint(k_lab, (B, S), 0, V, dtype=jnp.int32)
    labels = labels.at[0, 0].set(-100)          # exercise ignore_index=-100

    # f32-logits path for a tight numerical check against the reference.
    loss, logits = identity_wrapper_forward(
        input_ids, labels, embed_table, lm_head_w,
        block_tokens=8, block_vocab=128,
        return_logits=True, logits_dtype=jnp.float32)
    jax.block_until_ready((loss, logits))

    ref_loss, ref_logits = _reference(input_ids, labels, embed_table, lm_head_w)
    assert jnp.allclose(loss, ref_loss, rtol=1e-4, atol=1e-3), (loss, ref_loss)
    assert jnp.allclose(logits, ref_logits, rtol=1e-4, atol=1e-5)

    # Default (training-oriented) configuration: chip-aware tiles, bf16
    # logits, and the loss-only fast path that drops the N x V writeback.
    bt, bv = default_block_sizes(B * S, V)
    loss_bf16, logits_bf16 = identity_wrapper_forward(
        input_ids, labels, embed_table, lm_head_w,
        block_tokens=bt, block_vocab=bv, return_logits=True)
    loss_only, _ = identity_wrapper_forward(
        input_ids, labels, embed_table, lm_head_w,
        block_tokens=bt, block_vocab=bv, return_logits=False)
    jax.block_until_ready((loss_bf16, logits_bf16, loss_only))
    assert jnp.allclose(loss_bf16, ref_loss, rtol=1e-3, atol=1e-3)
    assert jnp.allclose(loss_only, ref_loss, rtol=1e-3, atol=1e-3)

    print("KERNEL_OK")
</pallas_src>

<mosaic_0001>
module attributes {stable_mosaic.version = 11 : i64} {
  func.func @_lmhead_ce_kernel(%arg0: i32, %arg1: i32, %arg2: memref<8x32xbf16, #tpu.memory_space<vmem>>, %arg3: memref<32x128xbf16, #tpu.memory_space<vmem>>, %arg4: memref<8x1xi32, #tpu.memory_space<vmem>>, %arg5: memref<8x128xf32, #tpu.memory_space<vmem>>, %arg6: memref<8x1xf32, #tpu.memory_space<vmem>>, %arg7: memref<8x1xf32, #tpu.memory_space<vmem>>, %arg8: memref<8x1xf32, #tpu.memory_space<vmem>>, %arg9: memref<8x1xf32, #tpu.memory_space<vmem>>) attributes {dimension_semantics = [#tpu.dimension_semantics<parallel>, #tpu.dimension_semantics<arbitrary>], iteration_bounds = array<i64: 2, 2>, scalar_prefetch = 0 : i64, scratch_operands = 3 : i64, tpu.core_type = #tpu.core_type<tc>, window_params = [{transform_indices = @transform_0, window_bounds = array<i64: 8, 32>}, {transform_indices = @transform_1, window_bounds = array<i64: 32, 128>}, {transform_indices = @transform_2, window_bounds = array<i64: 8, 1>}, {transform_indices = @transform_3, window_bounds = array<i64: 8, 128>}, {transform_indices = @transform_4, window_bounds = array<i64: 8, 1>}]} {
    %c0_i32 = arith.constant 0 : i32
    %0 = arith.cmpi eq, %arg1, %c0_i32 : i32
    %1 = arith.extui %0 : i1 to i32
    %c0_i32_0 = arith.constant 0 : i32
    %2 = arith.cmpi ne, %1, %c0_i32_0 : i32
    scf.if %2 {
      %cst_25 = arith.constant 0xFF800000 : f32
      %40 = vector.broadcast %cst_25 : f32 to vector<8x1xf32>
      %c0_26 = arith.constant 0 : index
      %c0_27 = arith.constant 0 : index
      %41 = vector.load %arg7[%c0_26, %c0_27] : memref<8x1xf32, #tpu.memory_space<vmem>>, vector<8x1xf32>
      tpu.vector_store %arg7[%c0_26, %c0_27], %40 {strides = array<i32>} : memref<8x1xf32, #tpu.memory_space<vmem>>, vector<8x1xf32>,
      %cst_28 = arith.constant 0.000000e+00 : f32
      %42 = vector.broadcast %cst_28 : f32 to vector<8x1xf32>
      %c0_29 = arith.constant 0 : index
      %c0_30 = arith.constant 0 : index
      %43 = vector.load %arg8[%c0_29, %c0_30] : memref<8x1xf32, #tpu.memory_space<vmem>>, vector<8x1xf32>
      tpu.vector_store %arg8[%c0_29, %c0_30], %42 {strides = array<i32>} : memref<8x1xf32, #tpu.memory_space<vmem>>, vector<8x1xf32>,
      %cst_31 = arith.constant 0.000000e+00 : f32
      %44 = vector.broadcast %cst_31 : f32 to vector<8x1xf32>
      %c0_32 = arith.constant 0 : index
      %c0_33 = arith.constant 0 : index
      %45 = vector.load %arg9[%c0_32, %c0_33] : memref<8x1xf32, #tpu.memory_space<vmem>>, vector<8x1xf32>
      tpu.vector_store %arg9[%c0_32, %c0_33], %44 {strides = array<i32>} : memref<8x1xf32, #tpu.memory_space<vmem>>, vector<8x1xf32>,
    } else {
    }
    %c0 = arith.constant 0 : index
    %c0_1 = arith.constant 0 : index
    %3 = vector.load %arg2[%c0, %c0_1] : memref<8x32xbf16, #tpu.memory_space<vmem>>, vector<8x32xbf16>
    %c0_2 = arith.constant 0 : index
    %c0_3 = arith.constant 0 : index
    %4 = vector.load %arg3[%c0_2, %c0_3] : memref<32x128xbf16, #tpu.memory_space<vmem>>, vector<32x128xbf16>
    %cst = arith.constant dense<0.000000e+00> : vector<8x128xf32>
    %5 = tpu.matmul %3, %4, %cst {dimension_numbers = #tpu.dot_dimension_numbers<[1], [0], [0], [1], [0, 0, 1, 1], [], []>} : vector<8x32xbf16>, vector<32x128xbf16>, vector<8x128xf32> -> vector<8x128xf32>
    %c0_4 = arith.constant 0 : index
    %c0_5 = arith.constant 0 : index
    %6 = vector.load %arg5[%c0_4, %c0_5] : memref<8x128xf32, #tpu.memory_space<vmem>>, vector<8x128xf32>
    tpu.vector_store %arg5[%c0_4, %c0_5], %5 {strides = array<i32>} : memref<8x128xf32, #tpu.memory_space<vmem>>, vector<8x128xf32>,
    %c0_6 = arith.constant 0 : index
    %c0_7 = arith.constant 0 : index
    %7 = vector.load %arg7[%c0_6, %c0_7] : memref<8x1xf32, #tpu.memory_space<vmem>>, vector<8x1xf32>
    %cst_8 = arith.constant dense<0xFF800000> : vector<8xf32>
    %8 = vector.multi_reduction <maximumf>, %5, %cst_8 [1] : vector<8x128xf32> to vector<8xf32>
    %9 = vector.shape_cast %8 : vector<8xf32> to vector<8x1xf32>
    %10 = arith.maximumf %7, %9 : vector<8x1xf32>
    %11 = arith.subf %7, %10 : vector<8x1xf32>
    %12 = math.exp %11 : vector<8x1xf32>
    %c0_9 = arith.constant 0 : index
    %c0_10 = arith.constant 0 : index
    %13 = vector.load %arg8[%c0_9, %c0_10] : memref<8x1xf32, #tpu.memory_space<vmem>>, vector<8x1xf32>
    %14 = arith.mulf %12, %13 : vector<8x1xf32>
    %15 = vector.broadcast %10 : vector<8x1xf32> to vector<8x128xf32>
    %16 = arith.subf %5, %15 : vector<8x128xf32>
    %17 = math.exp %16 : vector<8x128xf32>
    %cst_11 = arith.constant dense<0.000000e+00> : vector<8xf32>
    %18 = vector.multi_reduction <add>, %17, %cst_11 [1] : vector<8x128xf32> to vector<8xf32>
    %19 = vector.shape_cast %18 : vector<8xf32> to vector<8x1xf32>
    %20 = arith.addf %14, %19 : vector<8x1xf32>
    %c0_12 = arith.constant 0 : index
    %c0_13 = arith.constant 0 : index
    %21 = vector.load %arg8[%c0_12, %c0_13] : memref<8x1xf32, #tpu.memory_space<vmem>>, vector<8x1xf32>
    tpu.vector_store %arg8[%c0_12, %c0_13], %20 {strides = array<i32>} : memref<8x1xf32, #tpu.memory_space<vmem>>, vector<8x1xf32>,
    %c0_14 = arith.constant 0 : index
    %c0_15 = arith.constant 0 : index
    %22 = vector.load %arg7[%c0_14, %c0_15] : memref<8x1xf32, #tpu.memory_space<vmem>>, vector<8x1xf32>
    tpu.vector_store %arg7[%c0_14, %c0_15], %10 {strides = array<i32>} : memref<8x1xf32, #tpu.memory_space<vmem>>, vector<8x1xf32>,
    %c0_16 = arith.constant 0 : index
    %c0_17 = arith.constant 0 : index
    %23 = vector.load %arg4[%c0_16, %c0_17] : memref<8x1xi32, #tpu.memory_space<vmem>>, vector<8x1xi32>
    %c128_i32 = arith.constant 128 : i32
    %24 = arith.muli %arg1, %c128_i32 : i32
    %25 = vector.broadcast %24 : i32 to vector<8x1xi32>
    %26 = arith.subi %23, %25 : vector<8x1xi32>
    %27 = tpu.iota {dimensions = array<i32: 1>} : vector<8x128xi32>
    %28 = vector.broadcast %26 : vector<8x1xi32> to vector<8x128xi32>
    %29 = arith.cmpi eq, %27, %28 : vector<8x128xi32>
    %c0_18 = arith.constant 0 : index
    %c0_19 = arith.constant 0 : index
    %30 = vector.load %arg9[%c0_18, %c0_19] : memref<8x1xf32, #tpu.memory_space<vmem>>, vector<8x1xf32>
    %cst_20 = arith.constant 0.000000e+00 : f32
    %31 = vector.broadcast %cst_20 : f32 to vector<8x128xf32>
    %32 = arith.select %29, %5, %31 : vector<8x128xi1>, vector<8x128xf32>
    %cst_21 = arith.constant dense<0.000000e+00> : vector<8xf32>
    %33 = vector.multi_reduction <add>, %32, %cst_21 [1] : vector<8x128xf32> to vector<8xf32>
    %34 = vector.shape_cast %33 : vector<8xf32> to vector<8x1xf32>
    %35 = arith.addf %30, %34 : vector<8x1xf32>
    %c0_22 = arith.constant 0 : index
    %c0_23 = arith.constant 0 : index
    %36 = vector.load %arg9[%c0_22, %c0_23] : memref<8x1xf32, #tpu.memory_space<vmem>>, vector<8x1xf32>
    tpu.vector_store %arg9[%c0_22, %c0_23], %35 {strides = array<i32>} : memref<8x1xf32, #tpu.memory_space<vmem>>, vector<8x1xf32>,
    %c1_i32 = arith.constant 1 : i32
    %37 = arith.cmpi eq, %arg1, %c1_i32 : i32
    %38 = arith.extui %37 : i1 to i32
    %c0_i32_24 = arith.constant 0 : i32
    %39 = arith.cmpi ne, %38, %c0_i32_24 : i32
    scf.if %39 {
      %c0_25 = arith.constant 0 : index
      %c0_26 = arith.constant 0 : index
      %40 = vector.load %arg7[%c0_25, %c0_26] : memref<8x1xf32, #tpu.memory_space<vmem>>, vector<8x1xf32>
      %c0_27 = arith.constant 0 : index
      %c0_28 = arith.constant 0 : index
      %41 = vector.load %arg8[%c0_27, %c0_28] : memref<8x1xf32, #tpu.memory_space<vmem>>, vector<8x1xf32>
      %42 = math.log %41 : vector<8x1xf32>
      %43 = arith.addf %40, %42 : vector<8x1xf32>
      %c0_i32_29 = arith.constant 0 : i32
      %44 = vector.broadcast %c0_i32_29 : i32 to vector<8x1xi32>
      %45 = arith.cmpi sge, %23, %44 : vector<8x1xi32>
      %46 = arith.extui %45 : vector<8x1xi1> to vector<8x1xi32>
      %47 = arith.sitofp %46 : vector<8x1xi32> to vector<8x1xf32>
      %c0_30 = arith.constant 0 : index
      %c0_31 = arith.constant 0 : index
      %48 = vector.load %arg9[%c0_30, %c0_31] : memref<8x1xf32, #tpu.memory_space<vmem>>, vector<8x1xf32>
      %49 = arith.subf %43, %48 : vector<8x1xf32>
      %50 = arith.mulf %47, %49 : vector<8x1xf32>
      %c0_32 = arith.constant 0 : index
      %c0_33 = arith.constant 0 : index
      %51 = vector.load %arg6[%c0_32, %c0_33] : memref<8x1xf32, #tpu.memory_space<vmem>>, vector<8x1xf32>
      tpu.vector_store %arg6[%c0_32, %c0_33], %50 {strides = array<i32>} : memref<8x1xf32, #tpu.memory_space<vmem>>, vector<8x1xf32>,
    } else {
    }
    return
  }
  func.func @transform_0(%arg0: i32, %arg1: i32) -> (i32, i32) {
    %c0_i32 = arith.constant 0 : i32
    %c0_i32_0 = arith.constant 0 : i32
    return %arg0, %c0_i32 : i32, i32
  }
  func.func @transform_1(%arg0: i32, %arg1: i32) -> (i32, i32) {
    %c0_i32 = arith.constant 0 : i32
    %c0_i32_0 = arith.constant 0 : i32
    return %c0_i32, %arg1 : i32, i32
  }
  func.func @transform_2(%arg0: i32, %arg1: i32) -> (i32, i32) {
    %c0_i32 = arith.constant 0 : i32
    %c0_i32_0 = arith.constant 0 : i32
    return %arg0, %c0_i32 : i32, i32
  }
  func.func @transform_3(%arg0: i32, %arg1: i32) -> (i32, i32) {
    %c0_i32 = arith.constant 0 : i32
    return %arg0, %arg1 : i32, i32
  }
  func.func @transform_4(%arg0: i32, %arg1: i32) -> (i32, i32) {
    %c0_i32 = arith.constant 0 : i32
    %c0_i32_0 = arith.constant 0 : i32
    return %arg0, %c0_i32 : i32, i32
  }
}

</mosaic_0001>

<bundles_post_ra>
// kernel: identity_wrapper_forward.1
= control target key start
LH: loop header
LB: loop body
LE: loop exit
PB: predicated region body
PF: predicated region fallthrough
CT: control target
= control target key end

     0   :  { %s1050_s0 = inlined_call_operand.vmem [shape: bf16[16,32], index: 0, kind: input, shape index: {}]   ;;  %s1051_s1 = inlined_call_operand.vmem [shape: bf16[32,256], index: 1, kind: input, shape index: {}]   ;;  %s1052_s2 = inlined_call_operand.vmem [shape: s32[16,1], index: 2, kind: input, shape index: {}]   ;;  %s1053_s3 = inlined_call_operand.hbm [shape: f32[16,256], index: 3, kind: output, shape index: {0}]   ;;  %s1054_s4 = inlined_call_operand.vmem [shape: f32[16,1], index: 4, kind: output, shape index: {1}]  }
   0x1   :  { %1060 = sst [smem:[#allocation13_spill]] %s1051_s1 }
   0x2   :  { %10 = vsyncpa [#allocation7], 0 }
   0x3   :  { %12 = vsyncpa [#allocation7 + $0x1], 0  ;;  %s865_s15 = smov 0   ;;  %s867_s16 = smov 0  }
   0x4   :  { %s869_s17 = smov 0   ;;  %s871_s18 = smov 0  }
   0x5   :  { %s873_s19 = smov 0   ;;  %s875_s20 = smov 0  }
   0x6   :  { %s877_s21 = smov 0   ;;  %s879_s22 = smov 0  }
   0x7   :  { %s881_s23 = smov 0   ;;  %s883_s24 = smov 0  }
   0x8 LB: > { %1061 = sst [smem:[#allocation9_spill]] %s823_s22  ;;  %s585_s25 = sadd.s32 4294967295, %s831_s24   ;;  %s831_s24 = sphi %s883_s24, %s18_s24   ;;  %s827_s23 = sphi %s881_s23, %s1073_s23   ;;  %s823_s22 = sphi %s879_s22, %s1072_s22   ;;  %s819_s21 = sphi %s877_s21, %s1071_s21   ;;  %s815_s20 = sphi %s875_s20, %s1070_s20   ;;  %s811_s19 = sphi %s873_s19, %s1078_s19   ;;  %s807_s18 = sphi %s871_s18, %s1077_s18   ;;  %s803_s17 = sphi %s869_s17, %s1076_s17   ;;  %s799_s16 = sphi %s867_s16, %s1075_s16   ;;  %s795_s15 = sphi %s865_s15, %s1074_s15  }
   0x9   : > { %1062 = sst [smem:[#allocation10_spill]] %s827_s23  ;;  %s586_s26 = sadd.s32 4294967294, %s831_s24  }
   0xa   : > { %s27_s27 = sadd.s32 1, %s823_s22  ;;  %s30_s28 = sadd.s32 1, %s827_s23 }
   0xb   : > { %p28_p0 = scmp.ge.s32.totalorder %s27_s27, 2  ;;  %s63_s29 = sadd.s32 1, %s811_s19 }
   0xc   : > { %p70_p1 = scmp.ne.s32.totalorder %s811_s19, %s807_s18  ;;  %p71_p2 = scmp.eq.s32.totalorder %s831_s24, 0 }
   0xd   : > { %s1080_s27 = smov (%p28_p0, %s27_s27), 0  ;;  %s1082_s28 = smov (!%p28_p0, %s30_s28), %s827_s23 }
   0xe   : > { %1063 = sst [smem:[#allocation11_spill]] %s1080_s27  ;;  %s60_s30 = ssub.s32 %s823_s22, %s1080_s27 }
   0xf   : > { %p928_p3 = por %p71_p2, %p70_p1  ;;  %p32_p4 = scmp.ge.s32.totalorder %s1082_s28, 2 }
  0x10   : > { %p61_p5 = scmp.eq.s32.totalorder %s60_s30, 0  ;;  %s117_s6 = sadd.s32 1, %s803_s17 }
  0x11   : > { %p127_p6 = scmp.ne.s32.totalorder %s803_s17, %s799_s16  ;;  %s1084_s28 = smov (%p32_p4, %s1082_s28), 0 }
  0x12   : > { %1065 = sst [smem:[#allocation12_spill]] %s1084_s28  ;;  %s112_s8 = ssub.s32 %s827_s23, %s1084_s28 }
  0x13   : > { %s938_s7 = scalar_select %p61_p5, %s811_s19, %s63_s29  }
  0x14   : > { %p128_p7 = scmp.eq.s32.totalorder %s585_s25, 3  ;;  %s114_s9 = sor.u32 %s112_s8, %s60_s30 }
  0x15   : > { %p133_p8 = scmp.ne.s32.totalorder %s799_s16, %s795_s15  ;;  %p115_p9 = scmp.eq.s32.totalorder %s114_s9, 0 }
  0x16   : > { %p944_p10 = por %p128_p7, %p127_p6  ;;  %p134_p11 = scmp.eq.s32.totalorder %s586_s26, 3 }
  0x17   : > { %s949_s11 = scalar_select %p115_p9, %s803_s17, %s117_s6  }
  0x18   : > { %p951_p12 = por %p134_p11, %p133_p8  ;;  %p588_p13 = scmp.ge.s32.totalorder %s831_s24, 4 }
  0x1a   : > { %176 = sbr.rel (%p588_p13) target bundleno = 43 (0x2b), region = 16 }
  0x1f   : > { %186 = sbr.rel (!%p928_p3) target bundleno = 43 (0x2b), region = 24  ;;  %s188_s13 = sand.u32 (%p928_p3), 1, %s811_s19  }
  0x20   : > { %s590_s14 = sshll.u32 (%p928_p3), %s823_s22, 2  ;;  %s589_s25 = sshll.u32 (%p928_p3), %s188_s13, 4 }
  0x21   : > { %s1068_s1 = sld [smem:[#allocation13_spill]] (%p928_p3)  ;;  %s190_s6 = scalar_lea.vmem (%p928_p3), [#allocation5], %s589_s25 }
  0x27   : > { %s192_s26 = scalar_lea.vmem %s1068_s1, %s590_s14 }
  0x28   : > { %v209_v0 = vld [vmem:[%s192_s26] sm:$0xf]  ;;  %v211_v1 = vld [vmem:[%s192_s26 + $0x8] sm:$0xf]  ;;  %v213_v2 = vld [vmem:[%s192_s26 + $0x10] sm:$0xf] }
  0x29   : > { %210 = vst [vmem:[%s190_s6] sm:$0xf] %v209_v0  ;;  %212 = vst [vmem:[%s190_s6 + $0x4] sm:$0xf] %v211_v1  ;;  %v215_v3 = vld [vmem:[%s192_s26 + $0x18] sm:$0xf] }
  0x2a   : > { %214 = vst [vmem:[%s190_s6 + $0x8] sm:$0xf] %v213_v2  ;;  %216 = vst [vmem:[%s190_s6 + $0xc] sm:$0xf] %v215_v3 }
  0x2b PF: > { %p591_p0 = scmp.ge.s32.totalorder %s831_s24, 1  ;;  %p254_p1 = scmp.lt.s32.totalorder %s831_s24, 5 }
  0x2d   : > { %p255_p2 = pnand %p591_p0, %p254_p1 }
  0x2e   : > { %s261_s5 = sand.u32 (!%p255_p2), 1, %s807_s18   ;;  %s1058_s8 = sand.u32 (!%p255_p2), 1, %s799_s16  }
  0x2f   : > { %258 = sbr.rel (%p255_p2) target bundleno = 741 (0x2e5), region = 69  ;;  %s592_s9 = sshll.u32 (!%p255_p2), %s261_s5, 4 }
  0x30   : > { %s969_s13 = sshll.u32 (!%p255_p2), %s1058_s8, 3  ;;  %p298_p3 = scmp.lt.s32.totalorder (!%p255_p2), %s819_s21, 1 }
  0x31   : > { %s263_s8 = scalar_lea.vmem (!%p255_p2), [#allocation5], %s592_s9  ;;  %s291_s22 = scalar_lea.vmem (!%p255_p2), [#allocation6], %s969_s13 }
  0x32   : > { %p597_p4 = scmp.ne.s32.totalorder (!%p255_p2), %s815_s20, 0 }
  0x34   : > { %s299_s14 = scalar_select %p298_p3, %s819_s21, 1 }
  0x35   : > { %314 = sbr.rel (%p597_p4) target bundleno = 61 (0x3d), region = 77 }
  0x36   : > { %s594_s25 = sshll.u32 %s299_s14, 2  ;;  %s595_s29 = sshll.u32 %s299_s14, 3 }
  0x37   : > { %s301_s6 = scalar_lea.vmem %s1050_s0, %s594_s25  ;;  %s305_s27 = scalar_lea.vmem %s1052_s2, %s595_s29 }
  0x38   : > { %s982_s5 = scalar_lea.vmem %s1054_s4, %s595_s29 }
  0x3a   : > { %vm315_vm0 = vcmask 7168   ;;  %v833_v4 = vmov -inf   ;;  %v834_v5 = vmov 0.0  }
  0x3b   : > { %316 = vst.msk [vmem:[#allocation2] sm:$0xff] %vm315_vm0, %v833_v4  ;;  %317 = vst.msk [vmem:[#allocation3] sm:$0xff] %vm315_vm0, %v834_v5 }
  0x3c   : > { %318 = vst.msk [vmem:[#allocation4] sm:$0xff] %vm315_vm0, %v834_v5 }
  0x3d PF: > { %v715_v6 = vld [vmem:[%s263_s8 + $0x8] sm:$0xff]   ;;  %v835_v7 = vmov 0.0   ;;  %v716_v8 = vld [vmem:[%s263_s8] sm:$0xff]   ;;  %vm836_vm1 = vmmov 0   ;;  %s601_s1 = sshll.u32 %s815_s20, 7  ;;  %v837_v10 = vmov 0   ;;  %v408_v25 = vlaneseq }
  0x3e   : > { %612 = vmatprep.subr.bf16.mxu0 %v835_v7  ;;  %616 = vmatprep.mubr.msk.bf16.mxu0 %vm836_vm1, %v835_v7  ;;  %v404_v9 = vld [vmem:[%s305_s27] sm:$0xff]  ;;  %v406_v11 = vstv %s601_s1  ;;  %vm336_vm2 = vcmask 261120   ;;  %vm401_vm3 = vcmask 7168   ;;  %p602_p5 = scmp.ne.s32.totalorder %s815_s20, 1 }
  0x3f   : > { %613 = vmatpush3.bf16.msra.mxu0 %v715_v6  ;;  %714 = vset.pattern.permute.xlu1 %v837_v10  ;;  %v407_v12 = vsub.s32 %v404_v9, %v406_v11  ;;  %v319_v13 = vld [vmem:[%s301_s6] sm:$0xf]  ;;  %v409_v26 = vand.u32 127, %v408_v25 }
  0x40   : > { %614 = vmatprep.subr.bf16.mxu0 %v835_v7  ;;  %713 = vset.pattern.permute.xlu0 %v837_v10 }
  0x41   : > { %411 = vperm.xlu1 %714, %v407_v12  }
  0x42   : > { %v381_v18 = vld [vmem:[#allocation2] sm:$0xff]  ;;  %v388_v32 = vld [vmem:[#allocation3] sm:$0xff] }
  0x43   : > { %615 = vmatpush3.bf16.msra.mxu0 %v716_v8  ;;  %v414_v36 = vld [vmem:[#allocation4] sm:$0xff] }
  0x46   : > { %617 = vmatmul.mubr.msk.bf16.vlgmr.msra.gmra.mxu0 %vm336_vm2, %v319_v13 }
  0xbc   : > { %v412_v27 = vpop.permute.xlu1 %411 }
  0xbd   : > { %vm413_vm4 = vcmp.eq.s32.totalorder %v409_v26, %v412_v27 }
 0x106   : > { %v374_v14 = vpop.f32.mrf.mxu0 }
 0x107   : > { %380 = vst [vmem:[%s291_s22] sm:$0xff] %v374_v14  ;;  %382 = vmax.xlane.f32.xlu0 %v374_v14  ;;  %v415_v29 = vsel %vm413_vm4, %v374_v14, 0.0 }
 0x108   : > { %v618_v15 = vpop.f32.mrf.mxu0 }
 0x10a   : > { %v377_v16 = vpop.f32.mrf.mxu0 }
 0x10c   : > { %v619_v17 = vpop.f32.mrf.mxu0 }
 0x190   : > { %v383_v19 = vpop.xlane.xlu0 %382 }
 0x191   : > { %v384_v20 = vmax.f32 %v381_v18, %v383_v19 }
 0x193   : > { %v385_v21 = vsub.f32 %v381_v18, %v384_v20  ;;  %403 = vst.msk [vmem:[#allocation2] sm:$0xff] %vm401_vm3, %v384_v20  ;;  %392 = vperm.xlu0 %713, %v384_v20  }
 0x195   : > { %v386_v30 = vmul.f32 1.442695, %v385_v21 }
 0x20e   : > { %v393_v22 = vpop.permute.xlu0 %392 }
 0x20f   : > { %v395_v23 = vsub.f32 %v374_v14, %v393_v22 }
 0x211   : > { %v396_v24 = vmul.f32 1.442695, %v395_v23 }
 0x213   : > { %717 = vpow2.f32 %v396_v24 }
 0x214   : > { %719 = vpow2.f32 %v386_v30 }
 0x220   : > { %v718_v28 = vpop.eup %717 }
 0x221   : > { %398 = vadd.xlane.f32.xlu1 %v718_v28  ;;  %v720_v31 = vpop.eup %719 }
 0x222   : > { %v389_v33 = vmul.f32 %v720_v31, %v388_v32 }
 0x225   : > { %416 = vadd.xlane.f32.xlu1 %v415_v29 }
 0x2aa   : > { %v399_v34 = vpop.xlane.xlu1 %398 }
 0x2ab   : > { %v400_v35 = vadd.f32 %v399_v34, %v389_v33 }
 0x2ad   : > { %402 = vst.msk [vmem:[#allocation3] sm:$0xff] %vm401_vm3, %v400_v35  ;;  %423 = sbr.rel (%p602_p5) target bundleno = 716 (0x2cc), region = 81 }
 0x2ae   : > { %v417_v37 = vpop.xlane.xlu1 %416 }
 0x2af   : > { %v418_v38 = vadd.f32 %v417_v37, %v414_v36 }
 0x2b1   : > { %419 = vst.msk [vmem:[#allocation4] sm:$0xff] %vm401_vm3, %v418_v38 }
 0x2b2   : > { %v424_v41 = vld [vmem:[#allocation2] sm:$0xff]  ;;  %vm429_vm5 = vcmp.ge.s32.totalorder %v404_v9, 0  ;;  %v838_v45 = vmov 0.0  }
 0x2b3   : > { %v603_v46 = vsel %vm429_vm5, 1.0, %v838_v45 }
 0x2b4   : > { %v425_v39 = vld [vmem:[#allocation3] sm:$0xff] }
 0x2b5   : > { %721 = vlog2.f32 %v425_v39 }
 0x2b8   : > { %v432_v43 = vld [vmem:[#allocation4] sm:$0xff] }
 0x2c2   : > { %v722_v40 = vpop.eup %721 }
 0x2c3   : > { %v427_v42 = vmul.f32 0.6931472, %v722_v40 }
 0x2c5   : > { %v428_v44 = vadd.f32 %v427_v42, %v424_v41 }
 0x2c7   : > { %v433_v47 = vsub.f32 %v428_v44, %v432_v43 }
 0x2c9   : > { %v434_v48 = vmul.f32 %v603_v46, %v433_v47 }
 0x2cb   : > { %435 = vst.msk [vmem:[%s982_s5] sm:$0xff] %vm401_vm3, %v434_v48 }
 0x2cc PF: > { %s605_s23 = sshll.u32 %s819_s21, 1  ;;  %s456_s28 = sshll.u32 %s291_s22, 4  ;;  %s457_s28 = int_to_ptr.vmem [resolvable:$true] %s456_s28 }
 0x2cd   : > { %s452_s27 = sadd.s32 %s815_s20, %s605_s23  ;;  %s1069_s29 = sand.u32 1, %s799_s16  }
 0x2ce   : > { %s606_s8 = sshll.u32 %s452_s27, 7  ;;  %s437_s30 = scalar_lea.sflag [#allocation7], %s1069_s29 }
 0x2cf   : > { %s454_s25 = scalar_lea.hbm %s1053_s3, %s606_s8  ;;  %s723_s26 = scalar_lea.vmem %s457_s28, 128 }
 0x2d0   : > { %p724_p6 = scmp.ne.s32.totalorder %s457_s28, %s723_s26  ;;  %s839_s6 = smov [#allocation6]  }
 0x2d1   : > { %s727_s18 = sshll.u32 %s839_s6, 4  ;;  %s728_s18 = int_to_ptr.vmem [resolvable:$false] %s727_s18 }
 0x2d2   : > { %p725_p7 = pnand %p724_p6, %p944_p10  ;;  %s729_s21 = scalar_lea.vmem %s728_s18, 256 }
 0x2d3   : > { %p730_p9 = scmp.lt.s32.totalorder %s457_s28, %s728_s18  ;;  %p731_p11 = scmp.lt.s32.totalorder %s729_s21, %s723_s26 }
 0x2d4   : > { %p726_p8 = pneg %p725_p7 }
 0x2d5   : > { %p732_p13 = por %p731_p11, %p730_p9 }
 0x2d7   : > { %p733_p0 = pnand %p732_p13, %p726_p8 }
 0x2d9   : > { %736 = shalt.err (!%p733_p0)
}
 0x2da   : > { %s737_s20 = scalar_lea.hbm %s454_s25, 128  ;;  %s741_s5 = scalar_lea.hbm %s1053_s3, 512 }
 0x2db   : > { %p738_p1 = scmp.ne.s32.totalorder %s454_s25, %s737_s20  ;;  %p742_p4 = scmp.lt.s32.totalorder %s454_s25, %s1053_s3 }
 0x2dc   : > { %p743_p5 = scmp.lt.s32.totalorder %s741_s5, %s737_s20 }
 0x2dd   : > { %p739_p2 = pnand %p738_p1, %p944_p10 }
 0x2de   : > { %p744_p6 = por %p743_p5, %p742_p4 }
 0x2df   : > { %p740_p3 = pneg %p739_p2 }
 0x2e1   : > { %p745_p7 = pnand %p744_p6, %p740_p3 }
 0x2e3   : > { %748 = shalt.err (!%p745_p7)
}
 0x2e4   : > { %620 = dma.vmem_to_hbm [thread:$0]  (%p944_p10), %s457_s28, 128, %s454_s25, %s437_s30  }
 0x2e5 PF: > { %p626_p8 = scmp.ge.s32.totalorder %s831_s24, 2  ;;  %s471_s27 = sand.u32 1, %s795_s15  }
 0x2e6   : > { %s472_s8 = scalar_lea.sflag [#allocation7], %s471_s27 }
 0x2e7   : > { %p623_p9 = pnand %p626_p8, %p951_p12 }
 0x2e9   : > { %p624_p11 = pneg %p623_p9 }
 0x2eb   : > { %790 = dma.done.wait (%p624_p11), %s472_s8, 128  }
 0x2ec   : > { %792 = vsyncadd (%p624_p11), %s472_s8, 4294967168  ;;  %s18_s24 = sadd.s32 1, %s831_s24   ;;  %s1070_s20 = sld [smem:[#allocation9_spill]] }
 0x2ed   : > { %p15_p13 = scmp.ge.s32.totalorder %s18_s24, 6   ;;  %s1071_s21 = sld [smem:[#allocation10_spill]] }
 0x2ee   : > { %s1072_s22 = sld [smem:[#allocation11_spill]]  ;;  %s1074_s15 = smov %s799_s16 }
 0x2ef   : > { %s1073_s23 = sld [smem:[#allocation12_spill]]  ;;  %s1075_s16 = smov %s803_s17 }
 0x2f0   : > { %s1076_s17 = smov %s949_s11  ;;  %s1077_s18 = smov %s811_s19 }
 0x2f1   : > { %s1078_s19 = smov %s938_s7  ;;  %17 = sbr.rel (!%p15_p13) target bundleno = 8 (0x8), region = 139 }
 0x2f6   :  { %484 = vsyncpa [#allocation7], 1 }
 0x2f7   :  { %486 = vsyncpa [#allocation7 + $0x1], 1 }

</bundles_post_ra>
